<compile_context>
chip_gen: v7x
topology: tpu7x:2x2x1
jax: 0.10.0
libtpu: 0.0.40
codegen_flags: <defaults>
</compile_context>

<pallas_src>
import functools

import jax
import jax.numpy as jnp
import numpy as np
from jax import lax
from jax.experimental import pallas as pl
from jax.experimental.pallas import tpu as pltpu


def _antisym_rnn_kernel(a_t_ref, x0_ref, by_ref, out_ref, *, n, tmax, step):
    """AntisymmetricRNN recurrence for one batch tile.

    a_t_ref : (n, n)         A^T = triu(Z,1)^T - triu(Z,1) - 0.001*I  (prebuilt)
    x0_ref  : (bt, n)        initial states for this batch tile, row layout
    by_ref  : (1, n)         bias row (broadcast over batch)
    out_ref : (bt, tmax*n)   lane-dense output; column chunk t holds state t
    """
    bt = x0_ref.shape[0]

    a_t = a_t_ref[...]
    # Hoisted bias broadcast (JAX does not CSE broadcast_in_dim in the loop).
    by_b = jnp.broadcast_to(by_ref[...], (bt, n))

    # TODO(synk): if a bundle dump shows a per-step MXU weight push for the
    # loop-invariant a_t, switch to pltpu.matmul_push_rhs once before the loop
    # and pltpu.matmul_acc_lhs / matmul_pop per step to shorten the serial chain.

    # Fully unrolled recurrence with static-offset lane-dense stores.
    x = x0_ref[...]
    out_ref[:, 0:n] = x
    for i in range(tmax - 1):                       # tmax static, small
        y = jnp.dot(
            x, a_t,
            preferred_element_type=jnp.float32,
            precision=lax.Precision.HIGHEST,        # pinned: full f32 fidelity
        ) + by_b
        x = x + step * jnp.tanh(y)
        out_ref[:, (i + 1) * n:(i + 2) * n] = x


@functools.partial(jax.jit, static_argnames=("tmax", "step"))
def antisymmetric_rnn_forward(X0, Z, by, *, tmax, step):
    """X0: (bs, n), Z: (n, n) unconstrained C weight, by: (n, 1) bias column.

    Returns (bs, tmax, n), matching the PyTorch module's output layout.
    Note: `step` is a static arg; changing it triggers recompilation.
    """
    bs, n = X0.shape
    dtype = jnp.float32
    # TODO(synk): PyTorch module runs in float64; TPU has no f64 MXU path, so
    # the kernel computes in float32 (matmuls pinned to Precision.HIGHEST).

    # ---- exact parameter construction in the wrapper (fuses with the casts):
    #   A   = triu(Z,1) - triu(Z,1)^T - 0.001*I
    #   A^T = triu(Z,1)^T - triu(Z,1) - 0.001*I
    zf = Z.astype(dtype)
    zu = jnp.triu(zf, 1)
    a_t = zu.T - zu - 0.001 * jnp.eye(n, dtype=dtype)      # exactly skew - 0.001*I
    by_row = by.reshape(1, n).astype(dtype)
    x0 = X0.astype(dtype)

    # ---- batch tiling: one tile for small bs, parallel tiles for large bs
    # (on v7x the parallel axis shards across the two TensorCores).
    bt = bs
    for cand in (128, 64, 32, 16, 8):
        if bs % cand == 0:
            bt = cand
            break
    grid = (bs // bt,)

    kernel = functools.partial(
        _antisym_rnn_kernel, n=n, tmax=int(tmax), step=float(step)
    )

    out_flat = pl.pallas_call(
        kernel,
        out_shape=jax.ShapeDtypeStruct((bs, tmax * n), dtype),
        grid_spec=pltpu.PrefetchScalarGridSpec(
            num_scalar_prefetch=0,
            grid=grid,
            in_specs=[
                pl.BlockSpec((n, n), lambda b: (0, 0)),          # A^T: resident
                pl.BlockSpec((bt, n), lambda b: (b, 0)),         # batch tile of X0
                pl.BlockSpec((1, n), lambda b: (0, 0)),          # bias row: resident
            ],
            out_specs=pl.BlockSpec((bt, tmax * n), lambda b: (b, 0)),
        ),
        compiler_params=pltpu.CompilerParams(
            dimension_semantics=("parallel",),
        ),
    )(a_t, x0, by_row)

    # (bs, tmax*n) -> (bs, tmax, n): pure metadata reshape, no transpose op.
    return out_flat.reshape(bs, tmax, n)


def reference_forward_f64(X0, Z, by, *, tmax, step):
    """Float64 NumPy re-implementation of the PyTorch forward (verification)."""
    X0 = np.asarray(X0, dtype=np.float64)
    Z = np.asarray(Z, dtype=np.float64)
    by = np.asarray(by, dtype=np.float64)
    bs, n = X0.shape
    Zu = np.triu(Z, 1)
    W = Zu - Zu.T
    A = W - 0.001 * np.eye(n, dtype=np.float64)
    by_tiled = np.tile(by, (1, bs))                  # (n, bs)
    Xi = X0.T                                        # (n, bs)
    states = [Xi]
    for _ in range(tmax - 1):
        Yi = A @ Xi + by_tiled
        Xi = Xi + step * np.tanh(Yi)
        states.append(Xi)
    X = np.stack(states, axis=0)                     # (tmax, n, bs)
    return np.transpose(X, (2, 0, 1))                # (bs, tmax, n)


if __name__ == "__main__":
    # Small shapes consistent with the module: n=32 state dim, tmax=8, bs=8.
    n, tmax, bs = 32, 8, 8
    step = 0.1

    key = jax.random.PRNGKey(0)
    k_x, k_z, k_b = jax.random.split(key, 3)
    X0 = jax.random.normal(k_x, (bs, n), dtype=jnp.float32)
    Z = jax.random.normal(k_z, (n, n), dtype=jnp.float32)           # unconstrained C weight
    by = 0.05 * jax.random.normal(k_b, (n, 1), dtype=jnp.float32)   # provided bias (by_ind=False)

    out = antisymmetric_rnn_forward(X0, Z, by, tmax=tmax, step=step)
    out = jax.block_until_ready(out)

    ref = reference_forward_f64(X0, Z, by, tmax=tmax, step=step)

    assert out.shape == (bs, tmax, n), out.shape
    np.testing.assert_allclose(np.asarray(out), ref, rtol=1e-4, atol=1e-4)

    print("KERNEL_OK")
</pallas_src>

<mosaic_0001>
module attributes {stable_mosaic.version = 11 : i64} {
  func.func @_antisym_rnn_kernel(%arg0: i32, %arg1: memref<32x32xf32, #tpu.memory_space<vmem>>, %arg2: memref<8x32xf32, #tpu.memory_space<vmem>>, %arg3: memref<1x32xf32, #tpu.memory_space<vmem>>, %arg4: memref<8x256xf32, #tpu.memory_space<vmem>>) attributes {dimension_semantics = [#tpu.dimension_semantics<parallel>], iteration_bounds = array<i64: 1>, scalar_prefetch = 0 : i64, scratch_operands = 0 : i64, tpu.core_type = #tpu.core_type<tc>, window_params = [{pipeline_mode = #tpu.pipeline_mode<synchronous>, transform_indices = @transform_0, window_bounds = array<i64: 32, 32>}, {transform_indices = @transform_1, window_bounds = array<i64: 8, 32>}, {pipeline_mode = #tpu.pipeline_mode<synchronous>, transform_indices = @transform_2, window_bounds = array<i64: 1, 32>}, {transform_indices = @transform_3, window_bounds = array<i64: 8, 256>}]} {
    %c0 = arith.constant 0 : index
    %c0_0 = arith.constant 0 : index
    %0 = vector.load %arg1[%c0, %c0_0] : memref<32x32xf32, #tpu.memory_space<vmem>>, vector<32x32xf32>
    %c0_1 = arith.constant 0 : index
    %c0_2 = arith.constant 0 : index
    %1 = vector.load %arg3[%c0_1, %c0_2] : memref<1x32xf32, #tpu.memory_space<vmem>>, vector<1x32xf32>
    %2 = vector.shape_cast %1 : vector<1x32xf32> to vector<1x32xf32>
    %3 = vector.broadcast %2 : vector<1x32xf32> to vector<8x32xf32>
    %c0_3 = arith.constant 0 : index
    %c0_4 = arith.constant 0 : index
    %4 = vector.load %arg2[%c0_3, %c0_4] : memref<8x32xf32, #tpu.memory_space<vmem>>, vector<8x32xf32>
    %c0_5 = arith.constant 0 : index
    %c0_6 = arith.constant 0 : index
    %5 = vector.load %arg4[%c0_5, %c0_6] : memref<8x256xf32, #tpu.memory_space<vmem>>, vector<8x32xf32>
    tpu.vector_store %arg4[%c0_5, %c0_6], %4 {strides = array<i32>} : memref<8x256xf32, #tpu.memory_space<vmem>>, vector<8x32xf32>,
    %cst = arith.constant dense<0.000000e+00> : vector<8x32xf32>
    %6 = tpu.matmul %4, %0, %cst {dimension_numbers = #tpu.dot_dimension_numbers<[1], [0], [0], [1], [0, 0, 1, 1], [], []>, precision = #tpu.contract_precision<fp32>} : vector<8x32xf32>, vector<32x32xf32>, vector<8x32xf32> -> vector<8x32xf32>
    %7 = arith.addf %6, %3 : vector<8x32xf32>
    %8 = math.tanh %7 : vector<8x32xf32>
    %cst_7 = arith.constant 1.000000e-01 : f32
    %9 = vector.broadcast %cst_7 : f32 to vector<8x32xf32>
    %10 = arith.mulf %9, %8 : vector<8x32xf32>
    %11 = arith.addf %4, %10 : vector<8x32xf32>
    %c0_8 = arith.constant 0 : index
    %c32 = arith.constant 32 : index
    %12 = vector.load %arg4[%c0_8, %c32] : memref<8x256xf32, #tpu.memory_space<vmem>>, vector<8x32xf32>
    tpu.vector_store %arg4[%c0_8, %c32], %11 {strides = array<i32>} : memref<8x256xf32, #tpu.memory_space<vmem>>, vector<8x32xf32>,
    %cst_9 = arith.constant dense<0.000000e+00> : vector<8x32xf32>
    %13 = tpu.matmul %11, %0, %cst_9 {dimension_numbers = #tpu.dot_dimension_numbers<[1], [0], [0], [1], [0, 0, 1, 1], [], []>, precision = #tpu.contract_precision<fp32>} : vector<8x32xf32>, vector<32x32xf32>, vector<8x32xf32> -> vector<8x32xf32>
    %14 = arith.addf %13, %3 : vector<8x32xf32>
    %15 = math.tanh %14 : vector<8x32xf32>
    %cst_10 = arith.constant 1.000000e-01 : f32
    %16 = vector.broadcast %cst_10 : f32 to vector<8x32xf32>
    %17 = arith.mulf %16, %15 : vector<8x32xf32>
    %18 = arith.addf %11, %17 : vector<8x32xf32>
    %c0_11 = arith.constant 0 : index
    %c64 = arith.constant 64 : index
    %19 = vector.load %arg4[%c0_11, %c64] : memref<8x256xf32, #tpu.memory_space<vmem>>, vector<8x32xf32>
    tpu.vector_store %arg4[%c0_11, %c64], %18 {strides = array<i32>} : memref<8x256xf32, #tpu.memory_space<vmem>>, vector<8x32xf32>,
    %cst_12 = arith.constant dense<0.000000e+00> : vector<8x32xf32>
    %20 = tpu.matmul %18, %0, %cst_12 {dimension_numbers = #tpu.dot_dimension_numbers<[1], [0], [0], [1], [0, 0, 1, 1], [], []>, precision = #tpu.contract_precision<fp32>} : vector<8x32xf32>, vector<32x32xf32>, vector<8x32xf32> -> vector<8x32xf32>
    %21 = arith.addf %20, %3 : vector<8x32xf32>
    %22 = math.tanh %21 : vector<8x32xf32>
    %cst_13 = arith.constant 1.000000e-01 : f32
    %23 = vector.broadcast %cst_13 : f32 to vector<8x32xf32>
    %24 = arith.mulf %23, %22 : vector<8x32xf32>
    %25 = arith.addf %18, %24 : vector<8x32xf32>
    %c0_14 = arith.constant 0 : index
    %c96 = arith.constant 96 : index
    %26 = vector.load %arg4[%c0_14, %c96] : memref<8x256xf32, #tpu.memory_space<vmem>>, vector<8x32xf32>
    tpu.vector_store %arg4[%c0_14, %c96], %25 {strides = array<i32>} : memref<8x256xf32, #tpu.memory_space<vmem>>, vector<8x32xf32>,
    %cst_15 = arith.constant dense<0.000000e+00> : vector<8x32xf32>
    %27 = tpu.matmul %25, %0, %cst_15 {dimension_numbers = #tpu.dot_dimension_numbers<[1], [0], [0], [1], [0, 0, 1, 1], [], []>, precision = #tpu.contract_precision<fp32>} : vector<8x32xf32>, vector<32x32xf32>, vector<8x32xf32> -> vector<8x32xf32>
    %28 = arith.addf %27, %3 : vector<8x32xf32>
    %29 = math.tanh %28 : vector<8x32xf32>
    %cst_16 = arith.constant 1.000000e-01 : f32
    %30 = vector.broadcast %cst_16 : f32 to vector<8x32xf32>
    %31 = arith.mulf %30, %29 : vector<8x32xf32>
    %32 = arith.addf %25, %31 : vector<8x32xf32>
    %c0_17 = arith.constant 0 : index
    %c128 = arith.constant 128 : index
    %33 = vector.load %arg4[%c0_17, %c128] : memref<8x256xf32, #tpu.memory_space<vmem>>, vector<8x32xf32>
    tpu.vector_store %arg4[%c0_17, %c128], %32 {strides = array<i32>} : memref<8x256xf32, #tpu.memory_space<vmem>>, vector<8x32xf32>,
    %cst_18 = arith.constant dense<0.000000e+00> : vector<8x32xf32>
    %34 = tpu.matmul %32, %0, %cst_18 {dimension_numbers = #tpu.dot_dimension_numbers<[1], [0], [0], [1], [0, 0, 1, 1], [], []>, precision = #tpu.contract_precision<fp32>} : vector<8x32xf32>, vector<32x32xf32>, vector<8x32xf32> -> vector<8x32xf32>
    %35 = arith.addf %34, %3 : vector<8x32xf32>
    %36 = math.tanh %35 : vector<8x32xf32>
    %cst_19 = arith.constant 1.000000e-01 : f32
    %37 = vector.broadcast %cst_19 : f32 to vector<8x32xf32>
    %38 = arith.mulf %37, %36 : vector<8x32xf32>
    %39 = arith.addf %32, %38 : vector<8x32xf32>
    %c0_20 = arith.constant 0 : index
    %c160 = arith.constant 160 : index
    %40 = vector.load %arg4[%c0_20, %c160] : memref<8x256xf32, #tpu.memory_space<vmem>>, vector<8x32xf32>
    tpu.vector_store %arg4[%c0_20, %c160], %39 {strides = array<i32>} : memref<8x256xf32, #tpu.memory_space<vmem>>, vector<8x32xf32>,
    %cst_21 = arith.constant dense<0.000000e+00> : vector<8x32xf32>
    %41 = tpu.matmul %39, %0, %cst_21 {dimension_numbers = #tpu.dot_dimension_numbers<[1], [0], [0], [1], [0, 0, 1, 1], [], []>, precision = #tpu.contract_precision<fp32>} : vector<8x32xf32>, vector<32x32xf32>, vector<8x32xf32> -> vector<8x32xf32>
    %42 = arith.addf %41, %3 : vector<8x32xf32>
    %43 = math.tanh %42 : vector<8x32xf32>
    %cst_22 = arith.constant 1.000000e-01 : f32
    %44 = vector.broadcast %cst_22 : f32 to vector<8x32xf32>
    %45 = arith.mulf %44, %43 : vector<8x32xf32>
    %46 = arith.addf %39, %45 : vector<8x32xf32>
    %c0_23 = arith.constant 0 : index
    %c192 = arith.constant 192 : index
    %47 = vector.load %arg4[%c0_23, %c192] : memref<8x256xf32, #tpu.memory_space<vmem>>, vector<8x32xf32>
    tpu.vector_store %arg4[%c0_23, %c192], %46 {strides = array<i32>} : memref<8x256xf32, #tpu.memory_space<vmem>>, vector<8x32xf32>,
    %cst_24 = arith.constant dense<0.000000e+00> : vector<8x32xf32>
    %48 = tpu.matmul %46, %0, %cst_24 {dimension_numbers = #tpu.dot_dimension_numbers<[1], [0], [0], [1], [0, 0, 1, 1], [], []>, precision = #tpu.contract_precision<fp32>} : vector<8x32xf32>, vector<32x32xf32>, vector<8x32xf32> -> vector<8x32xf32>
    %49 = arith.addf %48, %3 : vector<8x32xf32>
    %50 = math.tanh %49 : vector<8x32xf32>
    %cst_25 = arith.constant 1.000000e-01 : f32
    %51 = vector.broadcast %cst_25 : f32 to vector<8x32xf32>
    %52 = arith.mulf %51, %50 : vector<8x32xf32>
    %53 = arith.addf %46, %52 : vector<8x32xf32>
    %c0_26 = arith.constant 0 : index
    %c224 = arith.constant 224 : index
    %54 = vector.load %arg4[%c0_26, %c224] : memref<8x256xf32, #tpu.memory_space<vmem>>, vector<8x32xf32>
    tpu.vector_store %arg4[%c0_26, %c224], %53 {strides = array<i32>} : memref<8x256xf32, #tpu.memory_space<vmem>>, vector<8x32xf32>,
    return
  }
  func.func @transform_0(%arg0: i32) -> (i32, i32) {
    %c0_i32 = arith.constant 0 : i32
    %c0_i32_0 = arith.constant 0 : i32
    %c0_i32_1 = arith.constant 0 : i32
    return %c0_i32, %c0_i32_0 : i32, i32
  }
  func.func @transform_1(%arg0: i32) -> (i32, i32) {
    %c0_i32 = arith.constant 0 : i32
    %c0_i32_0 = arith.constant 0 : i32
    return %arg0, %c0_i32 : i32, i32
  }
  func.func @transform_2(%arg0: i32) -> (i32, i32) {
    %c0_i32 = arith.constant 0 : i32
    %c0_i32_0 = arith.constant 0 : i32
    %c0_i32_1 = arith.constant 0 : i32
    return %c0_i32, %c0_i32_0 : i32, i32
  }
  func.func @transform_3(%arg0: i32) -> (i32, i32) {
    %c0_i32 = arith.constant 0 : i32
    %c0_i32_0 = arith.constant 0 : i32
    return %arg0, %c0_i32 : i32, i32
  }
}

</mosaic_0001>

<bundles_post_ra>
// kernel: antisymmetric_rnn_forward.1
= control target key start
LH: loop header
LB: loop body
LE: loop exit
PB: predicated region body
PF: predicated region fallthrough
CT: control target
= control target key end

     0   :  { %vm26_vm0 = vcmask 261120   ;;  %v4519_v0 = vmov 0.0|0.0   ;;  %vm4520_vm1 = vmmov 0   ;;  %v4521_v8 = vmov 0.0   ;;  %s4522_s24 = smov 32   ;;  %s4523_s26 = smov 64   ;;  %s4895_s0 = inlined_call_operand.vmem [shape: f32[32,32], index: 0, kind: input, shape index: {}]   ;;  %s4896_s1 = inlined_call_operand.vmem [shape: f32[8,32], index: 1, kind: input, shape index: {}]   ;;  %s4897_s3 = inlined_call_operand.vmem [shape: f32[8,256], index: 3, kind: output, shape index: {}]   ;;  %s4898_s2 = inlined_call_operand.vmem [shape: f32[1,32], index: 2, kind: input, shape index: {}]  }
   0x1   :  { %4171 = vmatprep.subr.bf16.mxu1 %v4519_v0  ;;  %4189 = vmatprep.subr.bf16.mxu0 %v4519_v0  ;;  %v14_v1 = vld [vmem:[%s4895_s0] sm:$0xff]  ;;  %v15_v2 = vld [vmem:[%s4895_s0 + $0x8] sm:$0xff]  ;;  %v16_v3 = vld [vmem:[%s4895_s0 + $0x10] sm:$0xff]  ;;  %vm523_vm2 = vcmask 523520   ;;  %vm1019_vm3 = vcmask 785920   ;;  %s4524_s4 = smov 96  }
   0x2   :  { %v32_v4 = vand.u32 4294901760, %v14_v1  ;;  %v35_v5 = vand.u32 4294901760, %v15_v2  ;;  %v17_v6 = vld [vmem:[%s4895_s0 + $0x18] sm:$0xff]  ;;  %v38_v7 = vand.u32 4294901760, %v16_v3  ;;  %3717 = vmatprep.mubr.msk.f32.mxu1 %vm4520_vm1, %v4521_v8  ;;  %3750 = vmatprep.mubr.msk.f32.mxu0 %vm4520_vm1, %v4521_v8  ;;  %v4566_v9 = vld [vmem:[%s4896_s1] sm:$0xff]  ;;  %vm1515_vm4 = vcmask 1048320  }
   0x3   :  { %v41_v10 = vand.u32 4294901760, %v17_v6  ;;  %v29_v11 = vsel %vm26_vm0, %v4566_v9, 0  ;;  %27 = vst.msk [vmem:[%s4897_s3] sm:$0xff] %vm26_vm0, %v4566_v9  ;;  %v4638_v41 = vld [vmem:[%s4898_s2] ss:$0 sm:$0xff] }
   0x4   :  { %v4570_v12 = vpack.c.bf16 %v35_v5, %v32_v4  ;;  %v100_v13 = vand.u32 4294901760, %v29_v11  ;;  %v112_v14 = vsub.f32 %v14_v1, %v32_v4  ;;  %v119_v15 = vsub.f32 %v15_v2, %v35_v5 }
   0x5   :  { %v126_v16 = vsub.f32 %v16_v3, %v38_v7  ;;  %v133_v17 = vsub.f32 %v17_v6, %v41_v10  ;;  %v4574_v18 = vpack.c.bf16 %v41_v10, %v38_v7 }
   0x6   :  { %4173 = vmatpush3.bf16.msra.mxu1 %v4570_v12  ;;  %4191 = vmatpush3.bf16.msra.mxu0 %v4570_v12  ;;  %v101_v19 = vsub.f32 %v29_v11, %v100_v13  ;;  %v113_v20 = vand.u32 4294901760, %v112_v14  ;;  %v120_v21 = vand.u32 4294901760, %v119_v15  ;;  %v4601_v39 = vpack.c.bf16 %v119_v15, %v112_v14 }
   0x7   :  { %4174 = vmatprep.subr.bf16.mxu1 %v4519_v0  ;;  %4192 = vmatprep.subr.bf16.mxu0 %v4519_v0  ;;  %v127_v22 = vand.u32 4294901760, %v126_v16  ;;  %v134_v23 = vand.u32 4294901760, %v133_v17  ;;  %v4607_v40 = vpack.c.bf16 %v133_v17, %v126_v16 }
   0x8   :  { %v102_v24 = vand.u32 4294901760, %v101_v19  ;;  %v114_v25 = vsub.f32 %v112_v14, %v113_v20  ;;  %v121_v26 = vsub.f32 %v119_v15, %v120_v21  ;;  %v4580_v32 = vpack.c.bf16 %v120_v21, %v113_v20 }
   0x9   :  { %v128_v27 = vsub.f32 %v126_v16, %v127_v22  ;;  %v135_v28 = vsub.f32 %v133_v17, %v134_v23  ;;  %v4587_v37 = vpack.c.bf16 %v134_v23, %v127_v22 }
   0xa   :  { %4176 = vmatpush3.bf16.msra.mxu1 %v4574_v18  ;;  %4194 = vmatpush3.bf16.msra.mxu0 %v4574_v18  ;;  %v103_v29 = vsub.f32 %v101_v19, %v102_v24  ;;  %v115_v30 = vand.u32 4294901760, %v114_v25  ;;  %v122_v31 = vand.u32 4294901760, %v121_v26 }
   0xb   :  { %4177 = vmatprep.subr.bf16.mxu1 %v4519_v0  ;;  %4195 = vmatprep.subr.bf16.mxu0 %v4519_v0  ;;  %v129_v33 = vand.u32 4294901760, %v128_v27  ;;  %v136_v34 = vand.u32 4294901760, %v135_v28 }
   0xc   :  { %v104_v35 = vand.u32 4294901760, %v103_v29  ;;  %v4584_v36 = vpack.c.bf16 %v122_v31, %v115_v30 }
   0xd   :  { %3751 = vmatmul.mubr.f32.vlgmr.msra.gmra.mrb[0].mxu0 %v102_v24  ;;  %v4591_v38 = vpack.c.bf16 %v136_v34, %v129_v33 }
   0xe   :  { %3718 = vmatmul.mubr.f32.vlgmr.msra.gmra.mrb[0].mxu1 %v104_v35  ;;  %4197 = vmatpush3.bf16.msra.mxu0 %v4580_v32 }
   0xf   :  { %4179 = vmatpush3.bf16.msra.mxu1 %v4584_v36  ;;  %4198 = vmatprep.subr.bf16.mxu0 %v4519_v0 }
  0x10   :  { %4180 = vmatprep.subr.bf16.mxu1 %v4519_v0  ;;  %3728 = vmatprep.mubr.msk.f32.mxu1 %vm4520_vm1, %v4521_v8 }
  0x11   :  { %3761 = vmatprep.mubr.msk.f32.mxu0 %vm4520_vm1, %v4521_v8 }
  0x12   :  { %4200 = vmatpush3.bf16.msra.mxu0 %v4587_v37 }
  0x13   :  { %4182 = vmatpush3.bf16.msra.mxu1 %v4591_v38  ;;  %4201 = vmatprep.subr.bf16.mxu0 %v4519_v0 }
  0x14   :  { %4183 = vmatprep.subr.bf16.mxu1 %v4519_v0 }
  0x15   :  { %3762 = vmatmul.mubr.f32.vlgmr.msra.gmra.mrb[0].mxu0 %v100_v13 }
  0x16   :  { %3729 = vmatmul.mubr.f32.vlgmr.msra.gmra.mrb[0].mxu1 %v100_v13  ;;  %4203 = vmatpush3.bf16.msra.mxu0 %v4570_v12 }
  0x17   :  { %4185 = vmatpush3.bf16.msra.mxu1 %v4601_v39  ;;  %4204 = vmatprep.subr.bf16.mxu0 %v4519_v0 }
  0x18   :  { %4186 = vmatprep.subr.bf16.mxu1 %v4519_v0  ;;  %3739 = vmatprep.mubr.msk.f32.mxu1 %vm4520_vm1, %v4521_v8 }
  0x19   :  { %3772 = vmatprep.mubr.msk.f32.mxu0 %vm4520_vm1, %v4521_v8 }
  0x1a   :  { %4206 = vmatpush3.bf16.msra.mxu0 %v4574_v18 }
  0x1b   :  { %4188 = vmatpush3.bf16.msra.mxu1 %v4607_v40  ;;  %4243 = vmatprep.subr.bf16.mxu0 %v4519_v0 }
  0x1c   :  { %4207 = vmatprep.subr.bf16.mxu1 %v4519_v0 }
  0x1d   :  { %3773 = vmatmul.mubr.f32.vlgmr.msra.gmra.mrb[0].mxu0 %v100_v13 }
  0x1e   :  { %3740 = vmatmul.mubr.f32.vlgmr.msra.gmra.mrb[0].mxu1 %v101_v19  ;;  %4245 = vmatpush3.bf16.msra.mxu0 %v4570_v12 }
  0x1f   :  { %4209 = vmatpush3.bf16.msra.mxu1 %v4570_v12  ;;  %3783 = vmatprep.mubr.msk.f32.mxu1 %vm4520_vm1, %v4521_v8 }
  0x20   :  { %4210 = vmatprep.subr.bf16.mxu1 %v4519_v0  ;;  %4246 = vmatprep.subr.bf16.mxu0 %v4519_v0 }
  0x21   :  { %3849 = vmatprep.mubr.msk.f32.mxu0 %vm4520_vm1, %v4521_v8 }
  0x22   :  { %4248 = vmatpush3.bf16.msra.mxu0 %v4574_v18 }
  0x23   :  { %4212 = vmatpush3.bf16.msra.mxu1 %v4574_v18  ;;  %4249 = vmatprep.subr.bf16.mxu0 %v4519_v0 }
  0x24   :  { %4213 = vmatprep.subr.bf16.mxu1 %v4519_v0 }
  0xf0   :  { %v512_v42 = vpop.f32.mrb[0].mxu0 }
  0xf1   :  { %v277_v43 = vpop.f32.mrb[0].mxu1  ;;  %v3774_v44 = vpop.f32.mrb[1].mxu0 }
  0xf2   :  { %v4423_v45 = vadd.f32 %v4638_v41, %v277_v43  ;;  %v3741_v46 = vpop.f32.mrb[1].mxu1 }
  0xf4   :  { %v4424_v47 = vadd.f32 %v4423_v45, %v512_v42 }
  0xf6   :  { %4505 = vtanh.f32 %v4424_v47 }
 0x100   :  { %v4506_v48 = vpop.eup %4505 }
 0x101   :  { %v517_v49 = vmul.f32 0.1, %v4506_v48 }
 0x103   :  { %v518_v50 = vadd.f32 %v517_v49, %v4566_v9 }
 0x105   :  { %520 = vrot.lane.b32.xlu0 %v518_v50, %s4522_s24  ;;  %v525_v51 = vsel %vm26_vm0, %v518_v50, 0 }
 0x106   :  { %v596_v52 = vand.u32 4294901760, %v525_v51 }
 0x108   :  { %v597_v53 = vsub.f32 %v525_v51, %v596_v52 }
 0x10a   :  { %v598_v54 = vand.u32 4294901760, %v597_v53 }
 0x10c   :  { %v599_v55 = vsub.f32 %v597_v53, %v598_v54 }
 0x10e   :  { %v600_v56 = vand.u32 4294901760, %v599_v55 }
 0x110   :  { %3784 = vmatmul.mubr.f32.vlgmr.msra.gmra.mrb[2].mxu1 %v600_v56 }
 0x111   :  { %4215 = vmatpush3.bf16.msra.mxu1 %v4584_v36  ;;  %3794 = vmatprep.mubr.msk.f32.mxu1 %vm4520_vm1, %v4521_v8 }
 0x112   :  { %4216 = vmatprep.subr.bf16.mxu1 %v4519_v0 }
 0x115   :  { %4218 = vmatpush3.bf16.msra.mxu1 %v4591_v38 }
 0x116   :  { %4219 = vmatprep.subr.bf16.mxu1 %v4519_v0 }
 0x118   :  { %3795 = vmatmul.mubr.f32.vlgmr.msra.gmra.mrb[2].mxu1 %v596_v52 }
 0x119   :  { %4221 = vmatpush3.bf16.msra.mxu1 %v4601_v39  ;;  %3805 = vmatprep.mubr.msk.f32.mxu1 %vm4520_vm1, %v4521_v8 }
 0x11a   :  { %4222 = vmatprep.subr.bf16.mxu1 %v4519_v0 }
 0x11d   :  { %4224 = vmatpush3.bf16.msra.mxu1 %v4607_v40 }
 0x11e   :  { %4225 = vmatprep.subr.bf16.mxu1 %v4519_v0 }
 0x120   :  { %3806 = vmatmul.mubr.f32.vlgmr.msra.gmra.mrb[2].mxu1 %v597_v53 }
 0x121   :  { %4227 = vmatpush3.bf16.msra.mxu1 %v4570_v12  ;;  %3816 = vmatprep.mubr.msk.f32.mxu1 %vm4520_vm1, %v4521_v8 }
 0x122   :  { %4228 = vmatprep.subr.bf16.mxu1 %v4519_v0 }
 0x125   :  { %4230 = vmatpush3.bf16.msra.mxu1 %v4574_v18 }
 0x126   :  { %4231 = vmatprep.subr.bf16.mxu1 %v4519_v0 }
 0x128   :  { %3817 = vmatmul.mubr.f32.vlgmr.msra.gmra.mrb[2].mxu1 %v598_v54 }
 0x129   :  { %4233 = vmatpush3.bf16.msra.mxu1 %v4580_v32  ;;  %3827 = vmatprep.mubr.msk.f32.mxu1 %vm4520_vm1, %v4521_v8 }
 0x12a   :  { %4234 = vmatprep.subr.bf16.mxu1 %v4519_v0 }
 0x12d   :  { %4236 = vmatpush3.bf16.msra.mxu1 %v4587_v37 }
 0x12e   :  { %4237 = vmatprep.subr.bf16.mxu1 %v4519_v0 }
 0x130   :  { %3828 = vmatmul.mubr.f32.vlgmr.msra.gmra.mrb[2].mxu1 %v596_v52 }
 0x131   :  { %4239 = vmatpush3.bf16.msra.mxu1 %v4570_v12  ;;  %3838 = vmatprep.mubr.msk.f32.mxu1 %vm4520_vm1, %v4521_v8 }
 0x132   :  { %4240 = vmatprep.subr.bf16.mxu1 %v4519_v0 }
 0x135   :  { %4242 = vmatpush3.bf16.msra.mxu1 %v4574_v18 }
 0x136   :  { %4279 = vmatprep.subr.bf16.mxu1 %v4519_v0 }
 0x138   :  { %3839 = vmatmul.mubr.f32.vlgmr.msra.gmra.mrb[2].mxu1 %v596_v52 }
 0x139   :  { %4281 = vmatpush3.bf16.msra.mxu1 %v4570_v12  ;;  %3915 = vmatprep.mubr.msk.f32.mxu1 %vm4520_vm1, %v4521_v8 }
 0x13a   :  { %4282 = vmatprep.subr.bf16.mxu1 %v4519_v0 }
 0x13d   :  { %4284 = vmatpush3.bf16.msra.mxu1 %v4574_v18 }
 0x13e   :  { %4285 = vmatprep.subr.bf16.mxu1 %v4519_v0 }
 0x177   :  { %v521_v57 = vpop.permute.xlu0 %520 }
 0x178   :  { %524 = vst.msk [vmem:[%s4897_s3] sm:$0xff] %vm523_vm2, %v521_v57 }
 0x20b   :  { %v1008_v58 = vpop.f32.mrb[2].mxu1 }
 0x20c   :  { %v4425_v59 = vadd.f32 %v4638_v41, %v1008_v58  ;;  %v3840_v60 = vpop.f32.mrb[3].mxu1 }
 0x20e   :  { %4507 = vtanh.f32 %v4425_v59 }
 0x218   :  { %v4508_v61 = vpop.eup %4507 }
 0x219   :  { %v1013_v62 = vmul.f32 0.1, %v4508_v61 }
 0x21b   :  { %v1014_v63 = vadd.f32 %v1013_v62, %v518_v50 }
 0x21d   :  { %1016 = vrot.lane.b32.xlu1 %v1014_v63, %s4523_s26  ;;  %v1021_v1 = vsel %vm26_vm0, %v1014_v63, 0 }
 0x21e   :  { %v1092_v2 = vand.u32 4294901760, %v1021_v1 }
 0x220   :  { %v1093_v3 = vsub.f32 %v1021_v1, %v1092_v2 }
 0x222   :  { %v1094_v4 = vand.u32 4294901760, %v1093_v3 }
 0x224   :  { %v1095_v5 = vsub.f32 %v1093_v3, %v1094_v4 }
 0x226   :  { %v1096_v6 = vand.u32 4294901760, %v1095_v5 }
 0x228   :  { %3850 = vmatmul.mubr.f32.vlgmr.msra.gmra.mrb[2].mxu0 %v1096_v6 }
 0x229   :  { %4251 = vmatpush3.bf16.msra.mxu0 %v4584_v36  ;;  %3860 = vmatprep.mubr.msk.f32.mxu0 %vm4520_vm1, %v4521_v8 }
 0x22a   :  { %4252 = vmatprep.subr.bf16.mxu0 %v4519_v0 }
 0x22d   :  { %4254 = vmatpush3.bf16.msra.mxu0 %v4591_v38 }
 0x22e   :  { %4255 = vmatprep.subr.bf16.mxu0 %v4519_v0 }
 0x230   :  { %3861 = vmatmul.mubr.f32.vlgmr.msra.gmra.mrb[2].mxu0 %v1092_v2 }
 0x231   :  { %4257 = vmatpush3.bf16.msra.mxu0 %v4601_v39  ;;  %3871 = vmatprep.mubr.msk.f32.mxu0 %vm4520_vm1, %v4521_v8 }
 0x232   :  { %4258 = vmatprep.subr.bf16.mxu0 %v4519_v0 }
 0x235   :  { %4260 = vmatpush3.bf16.msra.mxu0 %v4607_v40 }
 0x236   :  { %4261 = vmatprep.subr.bf16.mxu0 %v4519_v0 }
 0x238   :  { %3872 = vmatmul.mubr.f32.vlgmr.msra.gmra.mrb[2].mxu0 %v1093_v3 }
 0x239   :  { %4263 = vmatpush3.bf16.msra.mxu0 %v4570_v12  ;;  %3882 = vmatprep.mubr.msk.f32.mxu0 %vm4520_vm1, %v4521_v8 }
 0x23a   :  { %4264 = vmatprep.subr.bf16.mxu0 %v4519_v0 }
 0x23d   :  { %4266 = vmatpush3.bf16.msra.mxu0 %v4574_v18 }
 0x23e   :  { %4267 = vmatprep.subr.bf16.mxu0 %v4519_v0 }
 0x240   :  { %3883 = vmatmul.mubr.f32.vlgmr.msra.gmra.mrb[2].mxu0 %v1094_v4 }
 0x241   :  { %4269 = vmatpush3.bf16.msra.mxu0 %v4580_v32  ;;  %3893 = vmatprep.mubr.msk.f32.mxu0 %vm4520_vm1, %v4521_v8 }
 0x242   :  { %4270 = vmatprep.subr.bf16.mxu0 %v4519_v0 }
 0x245   :  { %4272 = vmatpush3.bf16.msra.mxu0 %v4587_v37 }
 0x246   :  { %4273 = vmatprep.subr.bf16.mxu0 %v4519_v0 }
 0x248   :  { %3894 = vmatmul.mubr.f32.vlgmr.msra.gmra.mrb[2].mxu0 %v1092_v2 }
 0x249   :  { %4275 = vmatpush3.bf16.msra.mxu0 %v4570_v12  ;;  %3904 = vmatprep.mubr.msk.f32.mxu0 %vm4520_vm1, %v4521_v8 }
 0x24a   :  { %4276 = vmatprep.subr.bf16.mxu0 %v4519_v0 }
 0x24d   :  { %4278 = vmatpush3.bf16.msra.mxu0 %v4574_v18 }
 0x24e   :  { %4315 = vmatprep.subr.bf16.mxu0 %v4519_v0 }
 0x250   :  { %3905 = vmatmul.mubr.f32.vlgmr.msra.gmra.mrb[2].mxu0 %v1092_v2 }
 0x251   :  { %4317 = vmatpush3.bf16.msra.mxu0 %v4570_v12  ;;  %3981 = vmatprep.mubr.msk.f32.mxu0 %vm4520_vm1, %v4521_v8 }
 0x252   :  { %4318 = vmatprep.subr.bf16.mxu0 %v4519_v0 }
 0x255   :  { %4320 = vmatpush3.bf16.msra.mxu0 %v4574_v18 }
 0x256   :  { %4321 = vmatprep.subr.bf16.mxu0 %v4519_v0 }
 0x28f   :  { %v1017_v7 = vpop.permute.xlu1 %1016 }
 0x290   :  { %1020 = vst.msk [vmem:[%s4897_s3] sm:$0xff] %vm1019_vm3, %v1017_v7 }
 0x323   :  { %v1504_v9 = vpop.f32.mrb[2].mxu0 }
 0x324   :  { %v4426_v10 = vadd.f32 %v4638_v41, %v1504_v9  ;;  %v3906_v11 = vpop.f32.mrb[3].mxu0 }
 0x326   :  { %4509 = vtanh.f32 %v4426_v10 }
 0x330   :  { %v4510_v13 = vpop.eup %4509 }
 0x331   :  { %v1509_v14 = vmul.f32 0.1, %v4510_v13 }
 0x333   :  { %v4728_v15 = vadd.f32 %v1509_v14, %v1014_v63 }
 0x335   :  { %v1517_v16 = vsel %vm26_vm0, %v4728_v15, 0 }
 0x336   :  { %v1588_v17 = vand.u32 4294901760, %v1517_v16 }
 0x338   :  { %v1589_v19 = vsub.f32 %v1517_v16, %v1588_v17 }
 0x33a   :  { %v1590_v20 = vand.u32 4294901760, %v1589_v19 }
 0x33c   :  { %v1591_v21 = vsub.f32 %v1589_v19, %v1590_v20 }
 0x33e   :  { %v1592_v22 = vand.u32 4294901760, %v1591_v21 }
 0x340   :  { %3916 = vmatmul.mubr.f32.vlgmr.msra.gmra.mrb[4].mxu1 %v1592_v22 }
 0x341   :  { %4287 = vmatpush3.bf16.msra.mxu1 %v4584_v36  ;;  %3926 = vmatprep.mubr.msk.f32.mxu1 %vm4520_vm1, %v4521_v8 }
 0x342   :  { %4288 = vmatprep.subr.bf16.mxu1 %v4519_v0 }
 0x345   :  { %4290 = vmatpush3.bf16.msra.mxu1 %v4591_v38 }
 0x346   :  { %4291 = vmatprep.subr.bf16.mxu1 %v4519_v0 }
 0x348   :  { %3927 = vmatmul.mubr.f32.vlgmr.msra.gmra.mrb[4].mxu1 %v1588_v17 }
 0x349   :  { %4293 = vmatpush3.bf16.msra.mxu1 %v4601_v39  ;;  %3937 = vmatprep.mubr.msk.f32.mxu1 %vm4520_vm1, %v4521_v8 }
 0x34a   :  { %4294 = vmatprep.subr.bf16.mxu1 %v4519_v0 }
 0x34d   :  { %4296 = vmatpush3.bf16.msra.mxu1 %v4607_v40 }
 0x34e   :  { %4297 = vmatprep.subr.bf16.mxu1 %v4519_v0 }
 0x350   :  { %3938 = vmatmul.mubr.f32.vlgmr.msra.gmra.mrb[4].mxu1 %v1589_v19 }
 0x351   :  { %4299 = vmatpush3.bf16.msra.mxu1 %v4570_v12  ;;  %3948 = vmatprep.mubr.msk.f32.mxu1 %vm4520_vm1, %v4521_v8 }
 0x352   :  { %4300 = vmatprep.subr.bf16.mxu1 %v4519_v0 }
 0x355   :  { %4302 = vmatpush3.bf16.msra.mxu1 %v4574_v18 }
 0x356   :  { %4303 = vmatprep.subr.bf16.mxu1 %v4519_v0 }
 0x358   :  { %3949 = vmatmul.mubr.f32.vlgmr.msra.gmra.mrb[4].mxu1 %v1590_v20 }
 0x359   :  { %4305 = vmatpush3.bf16.msra.mxu1 %v4580_v32  ;;  %3959 = vmatprep.mubr.msk.f32.mxu1 %vm4520_vm1, %v4521_v8 }
 0x35a   :  { %4306 = vmatprep.subr.bf16.mxu1 %v4519_v0 }
 0x35d   :  { %4308 = vmatpush3.bf16.msra.mxu1 %v4587_v37 }
 0x35e   :  { %4309 = vmatprep.subr.bf16.mxu1 %v4519_v0 }
 0x360   :  { %3960 = vmatmul.mubr.f32.vlgmr.msra.gmra.mrb[4].mxu1 %v1588_v17 }
 0x361   :  { %4311 = vmatpush3.bf16.msra.mxu1 %v4570_v12  ;;  %3970 = vmatprep.mubr.msk.f32.mxu1 %vm4520_vm1, %v4521_v8 }
 0x362   :  { %4312 = vmatprep.subr.bf16.mxu1 %v4519_v0 }
 0x365   :  { %4314 = vmatpush3.bf16.msra.mxu1 %v4574_v18 }
 0x366   :  { %4351 = vmatprep.subr.bf16.mxu1 %v4519_v0 }
 0x368   :  { %3971 = vmatmul.mubr.f32.vlgmr.msra.gmra.mrb[4].mxu1 %v1588_v17 }
 0x369   :  { %4353 = vmatpush3.bf16.msra.mxu1 %v4570_v12  ;;  %4047 = vmatprep.mubr.msk.f32.mxu1 %vm4520_vm1, %v4521_v8 }
 0x36a   :  { %4354 = vmatprep.subr.bf16.mxu1 %v4519_v0 }
 0x36d   :  { %4356 = vmatpush3.bf16.msra.mxu1 %v4574_v18 }
 0x36e   :  { %4357 = vmatprep.subr.bf16.mxu1 %v4519_v0 }
 0x43b   :  { %v2000_v23 = vpop.f32.mrb[4].mxu1 }
 0x43c   :  { %v4427_v24 = vadd.f32 %v4638_v41, %v2000_v23  ;;  %v3972_v25 = vpop.f32.mrb[5].mxu1 }
 0x43e   :  { %4511 = vtanh.f32 %v4427_v24 }
 0x448   :  { %v4512_v26 = vpop.eup %4511 }
 0x449   :  { %v2005_v27 = vmul.f32 0.1, %v4512_v26 }
 0x44b   :  { %v2006_v28 = vadd.f32 %v2005_v27, %v4728_v15 }
 0x44d   :  { %v2009_v29 = vsel %vm26_vm0, %v2006_v28, 0  ;;  %2007 = vst.msk [vmem:[%s4897_s3 + $0x8] sm:$0xff] %vm26_vm0, %v2006_v28 }
 0x44e   :  { %v2080_v30 = vand.u32 4294901760, %v2009_v29 }
 0x450   :  { %v2081_v31 = vsub.f32 %v2009_v29, %v2080_v30 }
 0x452   :  { %v2082_v33 = vand.u32 4294901760, %v2081_v31 }
 0x454   :  { %v2083_v34 = vsub.f32 %v2081_v31, %v2082_v33 }
 0x456   :  { %v2084_v35 = vand.u32 4294901760, %v2083_v34 }
 0x458   :  { %3982 = vmatmul.mubr.f32.vlgmr.msra.gmra.mrb[4].mxu0 %v2084_v35 }
 0x459   :  { %4323 = vmatpush3.bf16.msra.mxu0 %v4584_v36  ;;  %3992 = vmatprep.mubr.msk.f32.mxu0 %vm4520_vm1, %v4521_v8 }
 0x45a   :  { %4324 = vmatprep.subr.bf16.mxu0 %v4519_v0 }
 0x45d   :  { %4326 = vmatpush3.bf16.msra.mxu0 %v4591_v38 }
 0x45e   :  { %4327 = vmatprep.subr.bf16.mxu0 %v4519_v0 }
 0x460   :  { %3993 = vmatmul.mubr.f32.vlgmr.msra.gmra.mrb[4].mxu0 %v2080_v30 }
 0x461   :  { %4329 = vmatpush3.bf16.msra.mxu0 %v4601_v39  ;;  %4003 = vmatprep.mubr.msk.f32.mxu0 %vm4520_vm1, %v4521_v8 }
 0x462   :  { %4330 = vmatprep.subr.bf16.mxu0 %v4519_v0 }
 0x465   :  { %4332 = vmatpush3.bf16.msra.mxu0 %v4607_v40 }
 0x466   :  { %4333 = vmatprep.subr.bf16.mxu0 %v4519_v0 }
 0x468   :  { %4004 = vmatmul.mubr.f32.vlgmr.msra.gmra.mrb[4].mxu0 %v2081_v31 }
 0x469   :  { %4335 = vmatpush3.bf16.msra.mxu0 %v4570_v12  ;;  %4014 = vmatprep.mubr.msk.f32.mxu0 %vm4520_vm1, %v4521_v8 }
 0x46a   :  { %4336 = vmatprep.subr.bf16.mxu0 %v4519_v0 }
 0x46d   :  { %4338 = vmatpush3.bf16.msra.mxu0 %v4574_v18 }
 0x46e   :  { %4339 = vmatprep.subr.bf16.mxu0 %v4519_v0 }
 0x470   :  { %4015 = vmatmul.mubr.f32.vlgmr.msra.gmra.mrb[4].mxu0 %v2082_v33 }
 0x471   :  { %4341 = vmatpush3.bf16.msra.mxu0 %v4580_v32  ;;  %4025 = vmatprep.mubr.msk.f32.mxu0 %vm4520_vm1, %v4521_v8 }
 0x472   :  { %4342 = vmatprep.subr.bf16.mxu0 %v4519_v0 }
 0x475   :  { %4344 = vmatpush3.bf16.msra.mxu0 %v4587_v37 }
 0x476   :  { %4345 = vmatprep.subr.bf16.mxu0 %v4519_v0 }
 0x478   :  { %4026 = vmatmul.mubr.f32.vlgmr.msra.gmra.mrb[4].mxu0 %v2080_v30 }
 0x479   :  { %4347 = vmatpush3.bf16.msra.mxu0 %v4570_v12  ;;  %4036 = vmatprep.mubr.msk.f32.mxu0 %vm4520_vm1, %v4521_v8 }
 0x47a   :  { %4348 = vmatprep.subr.bf16.mxu0 %v4519_v0 }
 0x47d   :  { %4350 = vmatpush3.bf16.msra.mxu0 %v4574_v18 }
 0x47e   :  { %4387 = vmatprep.subr.bf16.mxu0 %v4519_v0 }
 0x480   :  { %4037 = vmatmul.mubr.f32.vlgmr.msra.gmra.mrb[4].mxu0 %v2080_v30 }
 0x481   :  { %4389 = vmatpush3.bf16.msra.mxu0 %v4570_v12  ;;  %4113 = vmatprep.mubr.msk.f32.mxu0 %vm4520_vm1, %v4521_v8 }
 0x482   :  { %4390 = vmatprep.subr.bf16.mxu0 %v4519_v0 }
 0x485   :  { %4392 = vmatpush3.bf16.msra.mxu0 %v4574_v18 }
 0x486   :  { %4393 = vmatprep.subr.bf16.mxu0 %v4519_v0 }
 0x553   :  { %v2492_v42 = vpop.f32.mrb[4].mxu0 }
 0x554   :  { %v4428_v43 = vadd.f32 %v4638_v41, %v2492_v42  ;;  %v4038_v44 = vpop.f32.mrb[5].mxu0 }
 0x556   :  { %4513 = vtanh.f32 %v4428_v43 }
 0x560   :  { %v4514_v45 = vpop.eup %4513 }
 0x561   :  { %v2497_v46 = vmul.f32 0.1, %v4514_v45 }
 0x563   :  { %v2498_v47 = vadd.f32 %v2497_v46, %v2006_v28 }
 0x565   :  { %2500 = vrot.lane.b32.xlu0 %v2498_v47, %s4522_s24  ;;  %v2504_v48 = vsel %vm26_vm0, %v2498_v47, 0 }
 0x566   :  { %v2575_v49 = vand.u32 4294901760, %v2504_v48 }
 0x568   :  { %v2576_v50 = vsub.f32 %v2504_v48, %v2575_v49 }
 0x569   :  { %1512 = vrot.lane.b32.xlu0 %v4728_v15, %s4524_s4 }
 0x56a   :  { %v2577_v51 = vand.u32 4294901760, %v2576_v50 }
 0x56c   :  { %v2578_v52 = vsub.f32 %v2576_v50, %v2577_v51 }
 0x56e   :  { %v2579_v53 = vand.u32 4294901760, %v2578_v52 }
 0x570   :  { %4048 = vmatmul.mubr.f32.vlgmr.msra.gmra.mrb[6].mxu1 %v2579_v53 }
 0x571   :  { %4359 = vmatpush3.bf16.msra.mxu1 %v4584_v36  ;;  %4058 = vmatprep.mubr.msk.f32.mxu1 %vm4520_vm1, %v4521_v8 }
 0x572   :  { %4360 = vmatprep.subr.bf16.mxu1 %v4519_v0 }
 0x575   :  { %4362 = vmatpush3.bf16.msra.mxu1 %v4591_v38 }
 0x576   :  { %4363 = vmatprep.subr.bf16.mxu1 %v4519_v0 }
 0x578   :  { %4059 = vmatmul.mubr.f32.vlgmr.msra.gmra.mrb[6].mxu1 %v2575_v49 }
 0x579   :  { %4365 = vmatpush3.bf16.msra.mxu1 %v4601_v39  ;;  %4069 = vmatprep.mubr.msk.f32.mxu1 %vm4520_vm1, %v4521_v8 }
 0x57a   :  { %4366 = vmatprep.subr.bf16.mxu1 %v4519_v0 }
 0x57d   :  { %4368 = vmatpush3.bf16.msra.mxu1 %v4607_v40 }
 0x57e   :  { %4369 = vmatprep.subr.bf16.mxu1 %v4519_v0 }
 0x580   :  { %4070 = vmatmul.mubr.f32.vlgmr.msra.gmra.mrb[6].mxu1 %v2576_v50 }
 0x581   :  { %4371 = vmatpush3.bf16.msra.mxu1 %v4570_v12  ;;  %4080 = vmatprep.mubr.msk.f32.mxu1 %vm4520_vm1, %v4521_v8 }
 0x582   :  { %4372 = vmatprep.subr.bf16.mxu1 %v4519_v0 }
 0x585   :  { %4374 = vmatpush3.bf16.msra.mxu1 %v4574_v18 }
 0x586   :  { %4375 = vmatprep.subr.bf16.mxu1 %v4519_v0 }
 0x588   :  { %4081 = vmatmul.mubr.f32.vlgmr.msra.gmra.mrb[6].mxu1 %v2577_v51 }
 0x589   :  { %4377 = vmatpush3.bf16.msra.mxu1 %v4580_v32  ;;  %4091 = vmatprep.mubr.msk.f32.mxu1 %vm4520_vm1, %v4521_v8 }
 0x58a   :  { %4378 = vmatprep.subr.bf16.mxu1 %v4519_v0 }
 0x58d   :  { %4380 = vmatpush3.bf16.msra.mxu1 %v4587_v37 }
 0x58e   :  { %4381 = vmatprep.subr.bf16.mxu1 %v4519_v0 }
 0x590   :  { %4092 = vmatmul.mubr.f32.vlgmr.msra.gmra.mrb[6].mxu1 %v2575_v49 }
 0x591   :  { %4383 = vmatpush3.bf16.msra.mxu1 %v4570_v12  ;;  %4102 = vmatprep.mubr.msk.f32.mxu1 %vm4520_vm1, %v4521_v8 }
 0x592   :  { %4384 = vmatprep.subr.bf16.mxu1 %v4519_v0 }
 0x595   :  { %4386 = vmatpush3.bf16.msra.mxu1 %v4574_v18 }
 0x598   :  { %4103 = vmatmul.mubr.f32.vlgmr.msra.gmra.mrb[6].mxu1 %v2575_v49 }
 0x5d7   :  { %v2501_v54 = vpop.permute.xlu0 %2500 }
 0x5d8   :  { %2503 = vst.msk [vmem:[%s4897_s3 + $0x8] sm:$0xff] %vm523_vm2, %v2501_v54 }
 0x5db   :  { %v1513_v55 = vpop.permute.xlu0 %1512 }
 0x5dc   :  { %1516 = vst.msk [vmem:[%s4897_s3] sm:$0xff] %vm1515_vm4, %v1513_v55 }
 0x66b   :  { %v2987_v56 = vpop.f32.mrb[6].mxu1 }
 0x66c   :  { %v4429_v57 = vadd.f32 %v4638_v41, %v2987_v56  ;;  %v4104_v58 = vpop.f32.mrb[7].mxu1 }
 0x66e   :  { %4515 = vtanh.f32 %v4429_v57 }
 0x678   :  { %v4516_v59 = vpop.eup %4515 }
 0x679   :  { %v2992_v60 = vmul.f32 0.1, %v4516_v59 }
 0x67b   :  { %v2993_v61 = vadd.f32 %v2992_v60, %v2498_v47 }
 0x67d   :  { %2995 = vrot.lane.b32.xlu1 %v2993_v61, %s4523_s26  ;;  %v2999_v62 = vsel %vm26_vm0, %v2993_v61, 0 }
 0x67e   :  { %v3070_v63 = vand.u32 4294901760, %v2999_v62 }
 0x680   :  { %v3071_v1 = vsub.f32 %v2999_v62, %v3070_v63 }
 0x682   :  { %v3072_v2 = vand.u32 4294901760, %v3071_v1 }
 0x684   :  { %v3073_v3 = vsub.f32 %v3071_v1, %v3072_v2 }
 0x686   :  { %v3074_v4 = vand.u32 4294901760, %v3073_v3 }
 0x688   :  { %4114 = vmatmul.mubr.f32.vlgmr.msra.gmra.mrb[6].mxu0 %v3074_v4 }
 0x689   :  { %4395 = vmatpush3.bf16.msra.mxu0 %v4584_v36  ;;  %4124 = vmatprep.mubr.msk.f32.mxu0 %vm4520_vm1, %v4521_v8 }
 0x68a   :  { %4396 = vmatprep.subr.bf16.mxu0 %v4519_v0 }
 0x68d   :  { %4398 = vmatpush3.bf16.msra.mxu0 %v4591_v38 }
 0x68e   :  { %4399 = vmatprep.subr.bf16.mxu0 %v4519_v0 }
 0x690   :  { %4125 = vmatmul.mubr.f32.vlgmr.msra.gmra.mrb[6].mxu0 %v3070_v63 }
 0x691   :  { %4401 = vmatpush3.bf16.msra.mxu0 %v4601_v39  ;;  %4135 = vmatprep.mubr.msk.f32.mxu0 %vm4520_vm1, %v4521_v8 }
 0x692   :  { %4402 = vmatprep.subr.bf16.mxu0 %v4519_v0 }
 0x695   :  { %4404 = vmatpush3.bf16.msra.mxu0 %v4607_v40 }
 0x696   :  { %4405 = vmatprep.subr.bf16.mxu0 %v4519_v0 }
 0x698   :  { %4136 = vmatmul.mubr.f32.vlgmr.msra.gmra.mrb[6].mxu0 %v3071_v1 }
 0x699   :  { %4407 = vmatpush3.bf16.msra.mxu0 %v4570_v12  ;;  %4146 = vmatprep.mubr.msk.f32.mxu0 %vm4520_vm1, %v4521_v8 }
 0x69a   :  { %4408 = vmatprep.subr.bf16.mxu0 %v4519_v0 }
 0x69d   :  { %4410 = vmatpush3.bf16.msra.mxu0 %v4574_v18 }
 0x69e   :  { %4411 = vmatprep.subr.bf16.mxu0 %v4519_v0 }
 0x6a0   :  { %4147 = vmatmul.mubr.f32.vlgmr.msra.gmra.mrb[6].mxu0 %v3072_v2 }
 0x6a1   :  { %4413 = vmatpush3.bf16.msra.mxu0 %v4580_v32  ;;  %4157 = vmatprep.mubr.msk.f32.mxu0 %vm4520_vm1, %v4521_v8 }
 0x6a2   :  { %4414 = vmatprep.subr.bf16.mxu0 %v4519_v0 }
 0x6a5   :  { %4416 = vmatpush3.bf16.msra.mxu0 %v4587_v37 }
 0x6a6   :  { %4417 = vmatprep.subr.bf16.mxu0 %v4519_v0 }
 0x6a8   :  { %4158 = vmatmul.mubr.f32.vlgmr.msra.gmra.mrb[6].mxu0 %v3070_v63 }
 0x6a9   :  { %4419 = vmatpush3.bf16.msra.mxu0 %v4570_v12  ;;  %4168 = vmatprep.mubr.msk.f32.mxu0 %vm4520_vm1, %v4521_v8 }
 0x6aa   :  { %4420 = vmatprep.subr.bf16.mxu0 %v4519_v0 }
 0x6ad   :  { %4422 = vmatpush3.bf16.msra.mxu0 %v4574_v18 }
 0x6b0   :  { %4169 = vmatmul.mubr.f32.vlgmr.msra.gmra.mrb[6].mxu0 %v3070_v63 }
 0x6ef   :  { %v2996_v32 = vpop.permute.xlu1 %2995 }
 0x6f0   :  { %2998 = vst.msk [vmem:[%s4897_s3 + $0x8] sm:$0xff] %vm1019_vm3, %v2996_v32 }
 0x783   :  { %v3482_v36 = vpop.f32.mrb[6].mxu0 }
 0x784   :  { %v4430_v37 = vadd.f32 %v4638_v41, %v3482_v36  ;;  %v4170_v38 = vpop.f32.mrb[7].mxu0 }
 0x786   :  { %4517 = vtanh.f32 %v4430_v37 }
 0x790   :  { %v4518_v12 = vpop.eup %4517 }
 0x791   :  { %v3487_v39 = vmul.f32 0.1, %v4518_v12 }
 0x793   :  { %v3488_v40 = vadd.f32 %v3487_v39, %v2993_v61 }
 0x795   :  { %3490 = vrot.lane.b32.xlu1 %v3488_v40, %s4524_s4 }
 0x807   :  { %v3491_v0 = vpop.permute.xlu1 %3490 }
 0x808   :  { %3493 = vst.msk [vmem:[%s4897_s3 + $0x8] sm:$0xff] %vm1515_vm4, %v3491_v0 }

</bundles_post_ra>
